<compile_context>
chip_gen: v7x
topology: tpu7x:2x2x1
jax: 0.10.0
libtpu: 0.0.40
codegen_flags: <defaults>
</compile_context>

<pallas_src>
import functools

import jax
import jax.numpy as jnp
from jax import lax
from jax.experimental import pallas as pl
from jax.experimental.pallas import tpu as pltpu


def _pick_hw_tile(hw, c, itemsize, max_block_bytes=2 << 20, max_tile=2048):
    """Largest lane tile that is a multiple of 128, divides hw, and keeps a
    (C, tile) block under ~max_block_bytes (so double-buffered input + output
    blocks stay comfortably inside the 32 MiB scoped-VMEM default on v7x)."""
    if hw % 128 != 0:
        # Cannot split the lane axis without violating the (8, 128) block rule;
        # fall back to the full (untiled) spatial extent.
        return hw
    budget = max(128, (max_block_bytes // max(1, c * itemsize)) // 128 * 128)
    cap = min(max_tile, budget, hw)
    best = 128
    t = 128
    while t <= cap:
        if hw % t == 0:
            best = t
        t += 128
    return best


def _stats_kernel(x_ref, rm_ref, rs_ref,
                  mean_ref, istd_ref, nrm_ref, nrs_ref,
                  *, eps, momentum, count):
    """Phase 1: accumulate per-channel sum / sumsq across the grid; finalize
    mean, inv_std and EMA running stats on the last grid step."""
    n_i, t_i = pl.program_id(0), pl.program_id(1)
    is_first = (n_i == 0) & (t_i == 0)
    is_last = ((n_i == pl.num_programs(0) - 1)
               & (t_i == pl.num_programs(1) - 1))

    @pl.when(is_first)
    def _():
        mean_ref[...] = jnp.zeros_like(mean_ref)   # holds running sum
        istd_ref[...] = jnp.zeros_like(istd_ref)   # holds running sum of squares

    x = x_ref[0].astype(jnp.float32)               # (C, TILE_HW)
    mean_ref[...] += jnp.sum(x, axis=1, keepdims=True)
    istd_ref[...] += jnp.sum(x * x, axis=1, keepdims=True)

    @pl.when(is_last)
    def _():
        s = mean_ref[...]
        ss = istd_ref[...]
        mean = s / count
        # Unbiased variance (ddof=1): the PyTorch module normalizes with
        # inputs.var() (default unbiased=True), unlike standard BatchNorm2d.
        var = (ss - s * mean) / (count - 1)
        inv_std = lax.rsqrt(var + eps)             # EUP rsqrt
        mean_ref[...] = mean
        istd_ref[...] = inv_std
        nrm_ref[...] = ((1.0 - momentum) * rm_ref[...].astype(jnp.float32)
                        + momentum * mean)
        nrs_ref[...] = ((1.0 - momentum) * rs_ref[...].astype(jnp.float32)
                        + momentum * inv_std)


def _normalize_kernel(x_ref, w_ref, b_ref, mean_ref, istd_ref, o_ref):
    """Phase 2: y = x * scale + shift, per-channel scale/shift (O(C) setup)."""
    scale = w_ref[...].astype(jnp.float32) * istd_ref[...].astype(jnp.float32)
    shift = (b_ref[...].astype(jnp.float32)
             - mean_ref[...].astype(jnp.float32) * scale)
    x = x_ref[0]
    if x.dtype == jnp.bfloat16:
        # v6e/v7x have native bf16 VPUs: keep the elementwise pass in bf16.
        o_ref[0] = (x * scale.astype(jnp.bfloat16)
                    + shift.astype(jnp.bfloat16)).astype(o_ref.dtype)
    else:
        o_ref[0] = (x.astype(jnp.float32) * scale + shift).astype(o_ref.dtype)


def contextual_batchnorm2d(x, weight, bias, running_mean, running_inv_std,
                           num_batches_tracked=0, *, eps=1e-5, momentum=0.1,
                           training=True, hw_tile=None):
    """x: (N, C, H, W). weight/bias/running_*: (1, C, 1, 1) like the module.

    Training mode returns (y, new_running_mean, new_running_inv_std,
    new_num_batches_tracked); eval mode returns just y.
    """
    N, C, H, W = x.shape
    HW = H * W

    x3d = x.reshape(N, C, HW)                      # free reshape, no transpose
    w2d = weight.reshape(C, 1)
    b2d = bias.reshape(C, 1)
    rm2d = running_mean.reshape(C, 1).astype(jnp.float32)
    rs2d = running_inv_std.reshape(C, 1).astype(jnp.float32)

    if hw_tile is None:
        hw_tile = _pick_hw_tile(HW, C, jnp.dtype(x.dtype).itemsize)
    assert HW % hw_tile == 0, "hw_tile must divide H*W"
    grid = (N, HW // hw_tile)

    x_spec = pl.BlockSpec((1, C, hw_tile), lambda n, t: (n, 0, t))
    col = pl.BlockSpec((C, 1), lambda n, t: (0, 0))

    if training:
        mean2d, istd2d, nrm2d, nrs2d = pl.pallas_call(
            functools.partial(_stats_kernel, eps=eps, momentum=momentum,
                              count=N * HW),
            grid=grid,
            in_specs=[x_spec, col, col],
            out_specs=(col, col, col, col),
            out_shape=tuple(jax.ShapeDtypeStruct((C, 1), jnp.float32)
                            for _ in range(4)),
            compiler_params=pltpu.CompilerParams(
                dimension_semantics=("arbitrary", "arbitrary")),
        )(x3d, rm2d, rs2d)
    else:
        mean2d, istd2d = rm2d, rs2d

    y3d = pl.pallas_call(
        _normalize_kernel,
        grid=grid,
        in_specs=[x_spec, col, col, col, col],
        out_specs=x_spec,
        out_shape=jax.ShapeDtypeStruct((N, C, HW), x.dtype),
        compiler_params=pltpu.CompilerParams(
            dimension_semantics=("parallel", "parallel")),
    )(x3d, w2d, b2d, mean2d, istd2d)

    y = y3d.reshape(N, C, H, W)
    if training:
        return (y,
                nrm2d.reshape(1, C, 1, 1),
                nrs2d.reshape(1, C, 1, 1),
                num_batches_tracked + 1)
    return y


def _reference_train(x, weight, bias, rm, rs, eps, momentum):
    mean = jnp.mean(x, axis=(0, 2, 3), keepdims=True)
    var = jnp.var(x, axis=(0, 2, 3), keepdims=True, ddof=1)  # unbiased
    inv_std = 1.0 / jnp.sqrt(var + eps)
    y = (x - mean) * (weight * inv_std) + bias
    new_rm = (1 - momentum) * rm + momentum * mean
    new_rs = (1 - momentum) * rs + momentum * inv_std
    return y, new_rm, new_rs


if __name__ == "__main__":
    key = jax.random.PRNGKey(0)
    eps, momentum = 1e-5, 0.1

    # --- Case 1: small shape, module-default init params -------------------
    N, C, H, W = 2, 4, 16, 16
    x = jax.random.normal(key, (N, C, H, W), dtype=jnp.float32)
    weight = jnp.ones((1, C, 1, 1), dtype=jnp.float32)
    bias = jnp.zeros((1, C, 1, 1), dtype=jnp.float32)
    running_mean = jnp.zeros((1, C, 1, 1), dtype=jnp.float32)     # get_init_running_stats
    running_inv_std = jnp.ones((1, C, 1, 1), dtype=jnp.float32)

    y, new_rm, new_rs, nbt = contextual_batchnorm2d(
        x, weight, bias, running_mean, running_inv_std, 0,
        eps=eps, momentum=momentum, training=True)
    jax.block_until_ready((y, new_rm, new_rs))

    y_eval = contextual_batchnorm2d(
        x, weight, bias, running_mean, running_inv_std,
        eps=eps, momentum=momentum, training=False)
    jax.block_until_ready(y_eval)

    y_ref, rm_ref, rs_ref = _reference_train(
        x, weight, bias, running_mean, running_inv_std, eps, momentum)
    y_eval_ref = (x - running_mean) * (weight * running_inv_std) + bias

    assert jnp.allclose(y, y_ref, atol=1e-5, rtol=1e-5)
    assert jnp.allclose(new_rm, rm_ref, atol=1e-5, rtol=1e-5)
    assert jnp.allclose(new_rs, rs_ref, atol=1e-5, rtol=1e-5)
    assert jnp.allclose(y_eval, y_eval_ref, atol=1e-6, rtol=1e-6)
    assert nbt == 1

    # --- Case 2: force multi-step HW tiling to exercise the accumulation ---
    k1, k2, k3, k4, k5 = jax.random.split(key, 5)
    N2, C2, H2, W2 = 2, 8, 16, 16
    x2 = jax.random.normal(k1, (N2, C2, H2, W2), dtype=jnp.float32) * 3.0 + 0.5
    w2 = jax.random.normal(k2, (1, C2, 1, 1), dtype=jnp.float32)
    b2 = jax.random.normal(k3, (1, C2, 1, 1), dtype=jnp.float32)
    rm2 = jax.random.normal(k4, (1, C2, 1, 1), dtype=jnp.float32)
    rs2 = jnp.abs(jax.random.normal(k5, (1, C2, 1, 1), dtype=jnp.float32)) + 0.5

    y2, nrm2, nrs2, _ = contextual_batchnorm2d(
        x2, w2, b2, rm2, rs2, 0, eps=eps, momentum=momentum,
        training=True, hw_tile=128)                     # grid = (2, 2)
    jax.block_until_ready((y2, nrm2, nrs2))

    y2_ref, rm2_ref, rs2_ref = _reference_train(x2, w2, b2, rm2, rs2, eps, momentum)
    assert jnp.allclose(y2, y2_ref, atol=1e-4, rtol=1e-4)
    assert jnp.allclose(nrm2, rm2_ref, atol=1e-5, rtol=1e-5)
    assert jnp.allclose(nrs2, rs2_ref, atol=1e-5, rtol=1e-5)

    print("KERNEL_OK")
</pallas_src>

<mosaic_0001>
module attributes {stable_mosaic.version = 11 : i64} {
  func.func @_stats_kernel(%arg0: i32, %arg1: i32, %arg2: memref<1x4x256xf32, #tpu.memory_space<vmem>>, %arg3: memref<4x1xf32, #tpu.memory_space<vmem>>, %arg4: memref<4x1xf32, #tpu.memory_space<vmem>>, %arg5: memref<4x1xf32, #tpu.memory_space<vmem>>, %arg6: memref<4x1xf32, #tpu.memory_space<vmem>>, %arg7: memref<4x1xf32, #tpu.memory_space<vmem>>, %arg8: memref<4x1xf32, #tpu.memory_space<vmem>>) attributes {dimension_semantics = [#tpu.dimension_semantics<arbitrary>, #tpu.dimension_semantics<arbitrary>], iteration_bounds = array<i64: 2, 1>, scalar_prefetch = 0 : i64, scratch_operands = 0 : i64, tpu.core_type = #tpu.core_type<tc>, window_params = [{transform_indices = @transform_0, window_bounds = array<i64: 1, 4, 256>}, {pipeline_mode = #tpu.pipeline_mode<synchronous>, transform_indices = @transform_1, window_bounds = array<i64: 4, 1>}, {pipeline_mode = #tpu.pipeline_mode<synchronous>, transform_indices = @transform_2, window_bounds = array<i64: 4, 1>}, {pipeline_mode = #tpu.pipeline_mode<synchronous>, transform_indices = @transform_3, window_bounds = array<i64: 4, 1>}, {pipeline_mode = #tpu.pipeline_mode<synchronous>, transform_indices = @transform_4, window_bounds = array<i64: 4, 1>}, {pipeline_mode = #tpu.pipeline_mode<synchronous>, transform_indices = @transform_5, window_bounds = array<i64: 4, 1>}, {pipeline_mode = #tpu.pipeline_mode<synchronous>, transform_indices = @transform_6, window_bounds = array<i64: 4, 1>}]} {
    %c0_i32 = arith.constant 0 : i32
    %0 = arith.cmpi eq, %arg0, %c0_i32 : i32
    %c0_i32_0 = arith.constant 0 : i32
    %1 = arith.cmpi eq, %arg1, %c0_i32_0 : i32
    %2 = arith.andi %0, %1 : i1
    %c1_i32 = arith.constant 1 : i32
    %3 = arith.cmpi eq, %arg0, %c1_i32 : i32
    %c0_i32_1 = arith.constant 0 : i32
    %4 = arith.cmpi eq, %arg1, %c0_i32_1 : i32
    %5 = arith.andi %3, %4 : i1
    %6 = arith.extui %2 : i1 to i32
    %c0_i32_2 = arith.constant 0 : i32
    %7 = arith.cmpi ne, %6, %c0_i32_2 : i32
    scf.if %7 {
      %cst_15 = arith.constant 0.000000e+00 : f32
      %23 = vector.broadcast %cst_15 : f32 to vector<4x1xf32>
      %c0_16 = arith.constant 0 : index
      %c0_17 = arith.constant 0 : index
      %24 = vector.load %arg5[%c0_16, %c0_17] : memref<4x1xf32, #tpu.memory_space<vmem>>, vector<4x1xf32>
      tpu.vector_store %arg5[%c0_16, %c0_17], %23 {strides = array<i32>} : memref<4x1xf32, #tpu.memory_space<vmem>>, vector<4x1xf32>,
      %cst_18 = arith.constant 0.000000e+00 : f32
      %25 = vector.broadcast %cst_18 : f32 to vector<4x1xf32>
      %c0_19 = arith.constant 0 : index
      %c0_20 = arith.constant 0 : index
      %26 = vector.load %arg6[%c0_19, %c0_20] : memref<4x1xf32, #tpu.memory_space<vmem>>, vector<4x1xf32>
      tpu.vector_store %arg6[%c0_19, %c0_20], %25 {strides = array<i32>} : memref<4x1xf32, #tpu.memory_space<vmem>>, vector<4x1xf32>,
    } else {
    }
    %c0 = arith.constant 0 : index
    %c0_3 = arith.constant 0 : index
    %c0_4 = arith.constant 0 : index
    %8 = vector.load %arg2[%c0, %c0_3, %c0_4] : memref<1x4x256xf32, #tpu.memory_space<vmem>>, vector<1x4x256xf32>
    %9 = vector.shape_cast %8 : vector<1x4x256xf32> to vector<4x256xf32>
    %c0_5 = arith.constant 0 : index
    %c0_6 = arith.constant 0 : index
    %10 = vector.load %arg5[%c0_5, %c0_6] : memref<4x1xf32, #tpu.memory_space<vmem>>, vector<4x1xf32>
    %cst = arith.constant dense<0.000000e+00> : vector<4xf32>
    %11 = vector.multi_reduction <add>, %9, %cst [1] : vector<4x256xf32> to vector<4xf32>
    %12 = vector.shape_cast %11 : vector<4xf32> to vector<4x1xf32>
    %13 = arith.addf %10, %12 : vector<4x1xf32>
    %c0_7 = arith.constant 0 : index
    %c0_8 = arith.constant 0 : index
    %14 = vector.load %arg5[%c0_7, %c0_8] : memref<4x1xf32, #tpu.memory_space<vmem>>, vector<4x1xf32>
    tpu.vector_store %arg5[%c0_7, %c0_8], %13 {strides = array<i32>} : memref<4x1xf32, #tpu.memory_space<vmem>>, vector<4x1xf32>,
    %c0_9 = arith.constant 0 : index
    %c0_10 = arith.constant 0 : index
    %15 = vector.load %arg6[%c0_9, %c0_10] : memref<4x1xf32, #tpu.memory_space<vmem>>, vector<4x1xf32>
    %16 = arith.mulf %9, %9 : vector<4x256xf32>
    %cst_11 = arith.constant dense<0.000000e+00> : vector<4xf32>
    %17 = vector.multi_reduction <add>, %16, %cst_11 [1] : vector<4x256xf32> to vector<4xf32>
    %18 = vector.shape_cast %17 : vector<4xf32> to vector<4x1xf32>
    %19 = arith.addf %15, %18 : vector<4x1xf32>
    %c0_12 = arith.constant 0 : index
    %c0_13 = arith.constant 0 : index
    %20 = vector.load %arg6[%c0_12, %c0_13] : memref<4x1xf32, #tpu.memory_space<vmem>>, vector<4x1xf32>
    tpu.vector_store %arg6[%c0_12, %c0_13], %19 {strides = array<i32>} : memref<4x1xf32, #tpu.memory_space<vmem>>, vector<4x1xf32>,
    %21 = arith.extui %5 : i1 to i32
    %c0_i32_14 = arith.constant 0 : i32
    %22 = arith.cmpi ne, %21, %c0_i32_14 : i32
    scf.if %22 {
      %c0_15 = arith.constant 0 : index
      %c0_16 = arith.constant 0 : index
      %23 = vector.load %arg5[%c0_15, %c0_16] : memref<4x1xf32, #tpu.memory_space<vmem>>, vector<4x1xf32>
      %c0_17 = arith.constant 0 : index
      %c0_18 = arith.constant 0 : index
      %24 = vector.load %arg6[%c0_17, %c0_18] : memref<4x1xf32, #tpu.memory_space<vmem>>, vector<4x1xf32>
      %cst_19 = arith.constant 5.120000e+02 : f32
      %25 = vector.broadcast %cst_19 : f32 to vector<4x1xf32>
      %26 = arith.divf %23, %25 : vector<4x1xf32>
      %27 = arith.mulf %23, %26 : vector<4x1xf32>
      %28 = arith.subf %24, %27 : vector<4x1xf32>
      %cst_20 = arith.constant 5.110000e+02 : f32
      %29 = vector.broadcast %cst_20 : f32 to vector<4x1xf32>
      %30 = arith.divf %28, %29 : vector<4x1xf32>
      %cst_21 = arith.constant 9.99999974E-6 : f32
      %31 = vector.broadcast %cst_21 : f32 to vector<4x1xf32>
      %32 = arith.addf %30, %31 : vector<4x1xf32>
      %33 = math.rsqrt %32 : vector<4x1xf32>
      %c0_22 = arith.constant 0 : index
      %c0_23 = arith.constant 0 : index
      %34 = vector.load %arg5[%c0_22, %c0_23] : memref<4x1xf32, #tpu.memory_space<vmem>>, vector<4x1xf32>
      tpu.vector_store %arg5[%c0_22, %c0_23], %26 {strides = array<i32>} : memref<4x1xf32, #tpu.memory_space<vmem>>, vector<4x1xf32>,
      %c0_24 = arith.constant 0 : index
      %c0_25 = arith.constant 0 : index
      %35 = vector.load %arg6[%c0_24, %c0_25] : memref<4x1xf32, #tpu.memory_space<vmem>>, vector<4x1xf32>
      tpu.vector_store %arg6[%c0_24, %c0_25], %33 {strides = array<i32>} : memref<4x1xf32, #tpu.memory_space<vmem>>, vector<4x1xf32>,
      %c0_26 = arith.constant 0 : index
      %c0_27 = arith.constant 0 : index
      %36 = vector.load %arg3[%c0_26, %c0_27] : memref<4x1xf32, #tpu.memory_space<vmem>>, vector<4x1xf32>
      %cst_28 = arith.constant 0.899999976 : f32
      %37 = vector.broadcast %cst_28 : f32 to vector<4x1xf32>
      %38 = arith.mulf %37, %36 : vector<4x1xf32>
      %cst_29 = arith.constant 1.000000e-01 : f32
      %39 = vector.broadcast %cst_29 : f32 to vector<4x1xf32>
      %40 = arith.mulf %39, %26 : vector<4x1xf32>
      %41 = arith.addf %38, %40 : vector<4x1xf32>
      %c0_30 = arith.constant 0 : index
      %c0_31 = arith.constant 0 : index
      %42 = vector.load %arg7[%c0_30, %c0_31] : memref<4x1xf32, #tpu.memory_space<vmem>>, vector<4x1xf32>
      tpu.vector_store %arg7[%c0_30, %c0_31], %41 {strides = array<i32>} : memref<4x1xf32, #tpu.memory_space<vmem>>, vector<4x1xf32>,
      %c0_32 = arith.constant 0 : index
      %c0_33 = arith.constant 0 : index
      %43 = vector.load %arg4[%c0_32, %c0_33] : memref<4x1xf32, #tpu.memory_space<vmem>>, vector<4x1xf32>
      %cst_34 = arith.constant 0.899999976 : f32
      %44 = vector.broadcast %cst_34 : f32 to vector<4x1xf32>
      %45 = arith.mulf %44, %43 : vector<4x1xf32>
      %cst_35 = arith.constant 1.000000e-01 : f32
      %46 = vector.broadcast %cst_35 : f32 to vector<4x1xf32>
      %47 = arith.mulf %46, %33 : vector<4x1xf32>
      %48 = arith.addf %45, %47 : vector<4x1xf32>
      %c0_36 = arith.constant 0 : index
      %c0_37 = arith.constant 0 : index
      %49 = vector.load %arg8[%c0_36, %c0_37] : memref<4x1xf32, #tpu.memory_space<vmem>>, vector<4x1xf32>
      tpu.vector_store %arg8[%c0_36, %c0_37], %48 {strides = array<i32>} : memref<4x1xf32, #tpu.memory_space<vmem>>, vector<4x1xf32>,
    } else {
    }
    return
  }
  func.func @transform_0(%arg0: i32, %arg1: i32) -> (i32, i32, i32) {
    %c0_i32 = arith.constant 0 : i32
    %c0_i32_0 = arith.constant 0 : i32
    return %arg0, %c0_i32, %arg1 : i32, i32, i32
  }
  func.func @transform_1(%arg0: i32, %arg1: i32) -> (i32, i32) {
    %c0_i32 = arith.constant 0 : i32
    %c0_i32_0 = arith.constant 0 : i32
    %c0_i32_1 = arith.constant 0 : i32
    return %c0_i32, %c0_i32_0 : i32, i32
  }
  func.func @transform_2(%arg0: i32, %arg1: i32) -> (i32, i32) {
    %c0_i32 = arith.constant 0 : i32
    %c0_i32_0 = arith.constant 0 : i32
    %c0_i32_1 = arith.constant 0 : i32
    return %c0_i32, %c0_i32_0 : i32, i32
  }
  func.func @transform_3(%arg0: i32, %arg1: i32) -> (i32, i32) {
    %c0_i32 = arith.constant 0 : i32
    %c0_i32_0 = arith.constant 0 : i32
    %c0_i32_1 = arith.constant 0 : i32
    return %c0_i32, %c0_i32_0 : i32, i32
  }
  func.func @transform_4(%arg0: i32, %arg1: i32) -> (i32, i32) {
    %c0_i32 = arith.constant 0 : i32
    %c0_i32_0 = arith.constant 0 : i32
    %c0_i32_1 = arith.constant 0 : i32
    return %c0_i32, %c0_i32_0 : i32, i32
  }
  func.func @transform_5(%arg0: i32, %arg1: i32) -> (i32, i32) {
    %c0_i32 = arith.constant 0 : i32
    %c0_i32_0 = arith.constant 0 : i32
    %c0_i32_1 = arith.constant 0 : i32
    return %c0_i32, %c0_i32_0 : i32, i32
  }
  func.func @transform_6(%arg0: i32, %arg1: i32) -> (i32, i32) {
    %c0_i32 = arith.constant 0 : i32
    %c0_i32_0 = arith.constant 0 : i32
    %c0_i32_1 = arith.constant 0 : i32
    return %c0_i32, %c0_i32_0 : i32, i32
  }
}

</mosaic_0001>

<bundles_post_ra>
// kernel: tpu_custom_call.1
= control target key start
LH: loop header
LB: loop body
LE: loop exit
PB: predicated region body
PF: predicated region fallthrough
CT: control target
= control target key end

     0   :  { %12 = vsyncpa [#allocation3], 0  ;;  %s760_s0 = inlined_call_operand.hbm [shape: f32[2,4,256], index: 0, kind: input, shape index: {}]   ;;  %s761_s1 = inlined_call_operand.vmem [shape: f32[4,1], index: 1, kind: input, shape index: {}]   ;;  %s762_s2 = inlined_call_operand.vmem [shape: f32[4,1], index: 2, kind: input, shape index: {}]   ;;  %s763_s3 = inlined_call_operand.vmem [shape: f32[4,1], index: 3, kind: output, shape index: {0}]   ;;  %s764_s4 = inlined_call_operand.vmem [shape: f32[4,1], index: 4, kind: output, shape index: {1}]   ;;  %s765_s5 = inlined_call_operand.vmem [shape: f32[4,1], index: 5, kind: output, shape index: {2}]   ;;  %s766_s6 = inlined_call_operand.vmem [shape: f32[4,1], index: 6, kind: output, shape index: {3}]  }
   0x1   :  { %14 = vsyncpa [#allocation3 + $0x1], 0  ;;  %s588_s21 = smov 0   ;;  %s590_s22 = smov 0  }
   0x2   :  { %s592_s23 = smov 0   ;;  %s594_s24 = smov 0  }
   0x3   :  { %s596_s25 = smov 0   ;;  %s598_s26 = smov 0  }
   0x4 LB: > { %s395_s27 = sadd.s32 4294967295, %s549_s26   ;;  %s32_s28 = sadd.s32 1, %s545_s25  ;;  %s549_s26 = sphi %s598_s26, %s20_s26   ;;  %s545_s25 = sphi %s596_s25, %s776_s25   ;;  %s541_s24 = sphi %s594_s24, %s775_s24   ;;  %s537_s23 = sphi %s592_s23, %s774_s23   ;;  %s533_s22 = sphi %s590_s22, %s773_s22   ;;  %s529_s21 = sphi %s588_s21, %s772_s21  }
   0x5   : > { %p34_p0 = scmp.ge.s32.totalorder %s32_s28, 2  ;;  %s41_s29 = sadd.s32 1, %s537_s23 }
   0x6   : > { %p48_p1 = scmp.ne.s32.totalorder %s537_s23, %s533_s22  ;;  %p49_p2 = scmp.eq.s32.totalorder %s549_s26, 0 }
   0x7   : > { %s778_s28 = smov (%p34_p0, %s32_s28), 0  ;;  %p54_p4 = scmp.ne.s32.totalorder %s533_s22, %s529_s21 }
   0x8   : > { %p624_p3 = por %p49_p2, %p48_p1  ;;  %s36_s7 = ssub.s32 %s545_s25, %s778_s28 }
   0x9   : > { %p55_p5 = scmp.eq.s32.totalorder %s395_s27, 0  ;;  %p39_p6 = scmp.eq.s32.totalorder %s36_s7, 0 }
   0xa   : > { %p416_p8 = scmp.lt.s32.totalorder %s549_s26, 2  ;;  %s210_s10 = sand.u32 1, %s537_s23  }
   0xb   : > { %p631_p7 = por %p55_p5, %p54_p4  ;;  %s407_s11 = sshll.u32 %s545_s25, 7 }
   0xc   : > { %s637_s9 = scalar_select %p39_p6, %s537_s23, %s41_s29  }
   0xd   : > { %s398_s12 = sshll.u32 %s210_s10, 3  ;;  %s644_s15 = scalar_lea.hbm %s760_s0, %s407_s11 }
   0xe   : > { %s214_s16 = scalar_lea.vmem [#allocation2], %s398_s12  ;;  %p648_p9 = pnand %p416_p8, %p624_p3 }
   0xf   : > { %s224_s17 = sshll.u32 %s214_s16, 4  ;;  %s211_s19 = scalar_lea.sflag [#allocation3], %s210_s10  ;;  %s652_s17 = int_to_ptr.vmem [resolvable:$true] %s224_s17 }
  0x10   : > { %s469_s20 = scalar_lea.hbm %s644_s15, 128  ;;  %p471_p13 = pneg %p648_p9 }
  0x11   : > { %p470_p12 = scmp.ne.s32.totalorder %s644_s15, %s469_s20  ;;  %s474_s29 = scalar_lea.hbm %s760_s0, 256 }
  0x12   : > { %p475_p2 = scmp.lt.u32.totalorder %s644_s15, %s760_s0  ;;  %p476_p3 = scmp.lt.u32.totalorder %s474_s29, %s469_s20 }
  0x13   : > { %p472_p0 = pnand %p471_p13, %p470_p12  ;;  %p478_p5 = scmp.lt.u32.totalorder %s469_s20, %s644_s15 }
  0x14   : > { %p477_p4 = por %p476_p3, %p475_p2 }
  0x15   : > { %p473_p1 = pneg %p472_p0 }
  0x16   : > { %p479_p6 = por %p478_p5, %p477_p4 }
  0x18   : > { %p480_p8 = pnand %p479_p6, %p473_p1 }
  0x1a   : > { %483 = shalt.err (!%p480_p8)
}
  0x1b   : > { %s484_s10 = scalar_lea.vmem %s652_s17, 128  ;;  %s551_s11 = smov [#allocation2]  }
  0x1c   : > { %p485_p12 = scmp.ne.s32.totalorder %s652_s17, %s484_s10  ;;  %s489_s12 = sshll.u32 %s551_s11, 4  ;;  %s490_s12 = int_to_ptr.vmem [resolvable:$false] %s489_s12 }
  0x1d   : > { %s491_s13 = scalar_lea.vmem %s490_s12, 256  ;;  %p492_p11 = scmp.lt.s32.totalorder %s652_s17, %s490_s12 }
  0x1e   : > { %p487_p0 = pnand %p485_p12, %p471_p13  ;;  %p493_p2 = scmp.lt.s32.totalorder %s491_s13, %s484_s10 }
  0x20   : > { %p488_p10 = pneg %p487_p0  ;;  %p494_p3 = por %p493_p2, %p492_p11 }
  0x22   : > { %p495_p4 = pnand %p494_p3, %p488_p10 }
  0x24   : > { %498 = shalt.err (!%p495_p4)
}
  0x25   : > { %415 = dma.hbm_to_vmem [thread:$0]  (!%p648_p9), %s644_s15, 128, %s652_s17, %s211_s19  }
  0x26   : > { %p770_p1 = scmp.lt.s32.totalorder %s549_s26, 3  ;;  %p771_p5 = scmp.ge.s32.totalorder %s549_s26, 1 }
  0x28   : > { %p230_p13 = pnand %p771_p5, %p770_p1 }
  0x29   : > { %s235_s14 = sand.u32 (!%p230_p13), 1, %s533_s22  }
  0x2a   : > { %233 = sbr.rel (%p230_p13) target bundleno = 243 (0xf3), region = 32  ;;  %s402_s16 = sshll.u32 (!%p230_p13), %s235_s14, 3 }
  0x2b   : > { %s236_s20 = scalar_lea.sflag (!%p230_p13), [#allocation3], %s235_s14  ;;  %s239_s21 = scalar_lea.vmem (!%p230_p13), [#allocation2], %s402_s16 }
  0x31   : > { %524 = dma.done.wait (%p631_p7), %s236_s20, 128  }
  0x32   : > { %526 = vsyncadd (%p631_p7), %s236_s20, 4294967168  ;;  %p264_p10 = scmp.eq.s32.totalorder %s541_s24, 0  ;;  %p268_p11 = scmp.eq.s32.totalorder %s541_s24, 1 }
  0x33   : > { %vm273_vm0 = vcmask (%p264_p10), 3072   ;;  %v552_v0 = vmov (%p264_p10), 0.0  }
  0x34   : > { %272 = sbr.rel (!%p264_p10) target bundleno = 59 (0x3b), region = 40  ;;  %274 = vst.msk [vmem:[%s763_s3] sm:$0xf] (%p264_p10), %vm273_vm0, %v552_v0  ;;  %275 = vst.msk [vmem:[%s764_s4] sm:$0xf] (%p264_p10), %vm273_vm0, %v552_v0 }
  0x3b PF: > { %v276_v1 = vld [vmem:[%s239_s21] sm:$0xff]  ;;  %vm281_vm1 = vcmask 1043456   ;;  %vm288_vm2 = vcmask 3072  }
  0x3c   : > { %v279_v2 = vcombine.high %v276_v1, %v276_v1  ;;  %v282_v3 = vsel %vm281_vm1, %v276_v1, 0.0  ;;  %v291_v4 = vmul.f32 %v276_v1, %v276_v1  ;;  %v277_v11 = vld [vmem:[%s763_s3] sm:$0xf] }
  0x3d   : > { %v290_v14 = vld [vmem:[%s764_s4] sm:$0xf] }
  0x3e   : > { %v283_v5 = vsel %vm281_vm1, %v279_v2, 0.0  ;;  %v293_v6 = vcombine.high %v291_v4, %v291_v4  ;;  %v295_v7 = vsel %vm281_vm1, %v291_v4, 0.0  ;;  %v316_v18 = vld [vmem:[%s761_s1] sm:$0xf] (%p268_p11) }
  0x3f   : > { %v284_v8 = vadd.f32 %v283_v5, %v282_v3  ;;  %v317_v20 = vmul.f32 (%p268_p11), 0.9, %v316_v18  ;;  %v321_v28 = vld [vmem:[%s762_s2] sm:$0xf] (%p268_p11) }
  0x40   : > { %v296_v9 = vsel %vm281_vm1, %v293_v6, 0.0  ;;  %v322_v29 = vmul.f32 (%p268_p11), 0.9, %v321_v28 }
  0x41   : > { %285 = vadd.xlane.f32.xlu0 %v284_v8  ;;  %v297_v10 = vadd.f32 %v296_v9, %v295_v7 }
  0x45   : > { %298 = vadd.xlane.f32.xlu0 %v297_v10 }
  0xce   : > { %v286_v12 = vpop.xlane.xlu0 %285 }
  0xcf   : > { %v287_v13 = vadd.f32 %v286_v12, %v277_v11  ;;  %303 = sbr.rel (!%p268_p11) target bundleno = 243 (0xf3), region = 44 }
  0xd1   : > { %289 = vst.msk [vmem:[%s763_s3] sm:$0xf] %vm288_vm2, %v287_v13 }
  0xd2   : > { %v299_v15 = vpop.xlane.xlu0 %298 }
  0xd3   : > { %v300_v16 = vadd.f32 %v299_v15, %v290_v14 }
  0xd5   : > { %301 = vst.msk [vmem:[%s764_s4] sm:$0xf] %vm288_vm2, %v300_v16 }
  0xd8   : > { %v304_v17 = vld [vmem:[%s763_s3] sm:$0xf] }
  0xd9   : > { %v307_v19 = vmul.f32 0.001953125, %v304_v17 }
  0xdb   : > { %314 = vst.msk [vmem:[%s763_s3] sm:$0xf] %vm288_vm2, %v307_v19  ;;  %v308_v22 = vmul.f32 %v307_v19, %v304_v17  ;;  %v318_v23 = vmul.f32 0.1, %v307_v19 }
  0xdc   : > { %v305_v21 = vld [vmem:[%s764_s4] sm:$0xf] }
  0xdd   : > { %v309_v24 = vsub.f32 %v305_v21, %v308_v22  ;;  %v319_v25 = vadd.f32 %v318_v23, %v317_v20 }
  0xdf   : > { %v311_v26 = vmul.f32 0.0019569471, %v309_v24  ;;  %320 = vst.msk [vmem:[%s765_s5] sm:$0xf] %vm288_vm2, %v319_v25 }
  0xe1   : > { %v312_v27 = vadd.f32 1e-05, %v311_v26 }
  0xe3   : > { %467 = vrsqrt.f32 %v312_v27 }
  0xed   : > { %v468_v30 = vpop.eup %467 }
  0xee   : > { %315 = vst.msk [vmem:[%s764_s4] sm:$0xf] %vm288_vm2, %v468_v30  ;;  %v323_v31 = vmul.f32 0.1, %v468_v30 }
  0xf0   : > { %v324_v32 = vadd.f32 %v323_v31, %v322_v29 }
  0xf2   : > { %325 = vst.msk [vmem:[%s766_s6] sm:$0xf] %vm288_vm2, %v324_v32 }
  0xf3 PF: > { %s20_s26 = sadd.s32 1, %s549_s26   ;;  %s772_s21 = smov %s533_s22 }
  0xf4   : > { %p17_p7 = scmp.ge.s32.totalorder %s20_s26, 4   ;;  %s773_s22 = smov %s537_s23 }
  0xf5   : > { %s774_s23 = smov %s637_s9  ;;  %s775_s24 = smov %s545_s25 }
  0xf6   : > { %s776_s25 = smov %s778_s28  ;;  %19 = sbr.rel (!%p17_p7) target bundleno = 4 (0x4), region = 100 }
  0xfd   :  { %355 = vsyncpa [#allocation3], 1 }
  0xfe   :  { %357 = vsyncpa [#allocation3 + $0x1], 1 }

</bundles_post_ra>
